<compile_context>
chip_gen: v7x
topology: tpu7x:2x2x1
jax: 0.10.0
libtpu: 0.0.40
codegen_flags: <defaults>
</compile_context>

<pallas_src>
import functools

import jax
import jax.numpy as jnp
from jax.experimental import pallas as pl
from jax.experimental.pallas import tpu as pltpu


def _round_up(x: int, m: int) -> int:
    return ((x + m - 1) // m) * m


def _l2norm_kernel(x_ref, w_ref, o_ref, *, eps):
    # x_ref: (C, T)   w_ref: (C, 1) f32   o_ref: (C, T)
    xf = x_ref[...].astype(jnp.float32)
    # Sum of squares across channels (sublane axis), f32 accumulation -> (1, T)
    ss = jnp.sum(xf * xf, axis=0, keepdims=True)
    # Exact reciprocal on the small (1, T) row; broadcast-multiply instead of
    # a full (C, T) divide.  (No approx reciprocal: keeps 1e-5 tolerance.)
    inv = 1.0 / (jnp.sqrt(ss) + eps)
    # Re-read the resident VMEM input block for the final multiply instead of
    # keeping the full (C, T) f32 upcast live across the reduction (cuts
    # vreg/VMEM pressure for bf16/fp16 inputs; a no-op for f32).
    y = w_ref[...] * x_ref[...].astype(jnp.float32) * inv
    o_ref[...] = y.astype(o_ref.dtype)


def _default_max_tile() -> int:
    # 128-MiB-VMEM parts (v5e/v6e): large tiles are free.  64-MiB parts
    # (v7x) and anything unknown: 1024 keeps ~86% of the roofline with half
    # the working set and more grid steps for the 2-TC split.
    try:
        info = pltpu.get_tpu_info()
        vmem = getattr(info, "vmem_capacity_bytes", 0) or 0
        if vmem >= (96 << 20):
            return 2048
    except Exception:
        pass
    return 1024


def _choose_tile(HW: int, N: int, max_tile: int) -> int:
    if HW <= max_tile:
        tile = HW          # one full-width block (block dim == full array dim)
    else:
        tile = max_tile    # multiple of 128; ragged last block is masked
    # Megacore (v7x has 2 TCs): guarantee >= 2 parallel grid steps when it is
    # cheap to do so (no benefit from a "parallel" axis with 1 iteration).
    if N * pl.cdiv(HW, tile) < 2 and HW > 256:
        tile = _round_up(pl.cdiv(HW, 2), 128)
    return tile


def l2norm(x, weight, eps: float = 1e-10, max_tile=None):
    """x: (N, C, H, W) array, weight: (C,) per-channel scale (SSD L2Norm)."""
    N, C, H, W = x.shape
    HW = H * W
    if max_tile is None:
        max_tile = _default_max_tile()

    tile = _choose_tile(HW, N, max_tile)
    n_sp = pl.cdiv(HW, tile)          # partial last block handled by Pallas
    grid = (N, n_sp)

    x3 = x.reshape(N, C, HW)                       # free view (contiguous)
    w2 = weight.astype(jnp.float32).reshape(C, 1)  # f32 cast hoisted once

    # Scoped-VMEM request sized to the actual working set (double-buffered
    # in + out blocks + weight + headroom) instead of a blanket 48 MiB.
    block_bytes = C * tile * x.dtype.itemsize
    vmem_limit = int(min(max(8 * block_bytes + (8 << 20), 16 << 20), 96 << 20))

    out3 = pl.pallas_call(
        functools.partial(_l2norm_kernel, eps=eps),
        out_shape=jax.ShapeDtypeStruct((N, C, HW), x.dtype),
        grid_spec=pltpu.PrefetchScalarGridSpec(
            num_scalar_prefetch=0,
            grid=grid,
            in_specs=[
                # batch dim squeezed away -> kernel sees (C, tile)
                pl.BlockSpec((pl.Squeezed(), C, tile), lambda n, t: (n, 0, t)),
                # weight: constant block index -> stays resident in VMEM
                pl.BlockSpec((C, 1), lambda n, t: (0, 0)),
            ],
            out_specs=pl.BlockSpec(
                (pl.Squeezed(), C, tile), lambda n, t: (n, 0, t)
            ),
        ),
        compiler_params=pltpu.CompilerParams(
            dimension_semantics=("parallel", "parallel"),
            vmem_limit_bytes=vmem_limit,
        ),
    )(x3, w2)

    return out3.reshape(N, C, H, W)


def _ref_l2norm(x, weight, eps=1e-10):
    norm = jnp.sqrt(jnp.sum(x * x, axis=1, keepdims=True)) + eps
    return weight.reshape(1, -1, 1, 1) * (x / norm)


if __name__ == "__main__":
    key = jax.random.PRNGKey(0)
    C = 4
    scale_init = 20.0  # typical SSD L2Norm scale init
    weight = jnp.full((C,), scale_init, dtype=jnp.float32)  # constant_ init

    # 1) Basic shape, HW multiple of 128.
    x = jax.random.normal(key, (2, C, 16, 16), dtype=jnp.float32)
    out = jax.block_until_ready(l2norm(x, weight))
    ref = _ref_l2norm(x, weight)
    assert out.shape == x.shape
    assert jnp.allclose(out, ref, atol=1e-5, rtol=1e-5), "mismatch vs reference"

    # 2) Ragged spatial size (HW not a multiple of 128), single full block.
    x2 = jax.random.normal(jax.random.PRNGKey(1), (2, C, 6, 6), dtype=jnp.float32)
    out2 = jax.block_until_ready(l2norm(x2, weight))
    ref2 = _ref_l2norm(x2, weight)
    assert jnp.allclose(out2, ref2, atol=1e-5, rtol=1e-5), "ragged mismatch"

    # 3) N=1 with HW>256: exercises the v7x split heuristic + masked partial
    #    last lane block (HW=324, tile=256, grid=(1,2)).
    x3 = jax.random.normal(jax.random.PRNGKey(2), (1, C, 18, 18), dtype=jnp.float32)
    out3 = jax.block_until_ready(l2norm(x3, weight))
    ref3 = _ref_l2norm(x3, weight)
    assert jnp.allclose(out3, ref3, atol=1e-5, rtol=1e-5), "split/partial mismatch"

    # 4) Force HW > max_tile with a ragged remainder (multi-step + masked tail).
    x4 = jax.random.normal(jax.random.PRNGKey(3), (2, C, 18, 18), dtype=jnp.float32)
    out4 = jax.block_until_ready(l2norm(x4, weight, max_tile=128))
    ref4 = _ref_l2norm(x4, weight)
    assert jnp.allclose(out4, ref4, atol=1e-5, rtol=1e-5), "multi-tile mismatch"

    print("KERNEL_OK")
</pallas_src>

<mosaic_0001>
module attributes {stable_mosaic.version = 11 : i64} {
  func.func @_l2norm_kernel(%arg0: i32, %arg1: i32, %arg2: memref<1x4x256xf32, #tpu.memory_space<vmem>>, %arg3: memref<4x1xf32, #tpu.memory_space<vmem>>, %arg4: memref<1x4x256xf32, #tpu.memory_space<vmem>>) attributes {dimension_semantics = [#tpu.dimension_semantics<parallel>, #tpu.dimension_semantics<parallel>], iteration_bounds = array<i64: 2, 1>, scalar_prefetch = 0 : i64, scratch_operands = 0 : i64, tpu.core_type = #tpu.core_type<tc>, window_params = [{transform_indices = @transform_0, window_bounds = array<i64: 1, 4, 256>}, {pipeline_mode = #tpu.pipeline_mode<synchronous>, transform_indices = @transform_1, window_bounds = array<i64: 4, 1>}, {transform_indices = @transform_2, window_bounds = array<i64: 1, 4, 256>}]} {
    %c0 = arith.constant 0 : index
    %c0_0 = arith.constant 0 : index
    %c0_1 = arith.constant 0 : index
    %0 = vector.load %arg2[%c0, %c0_0, %c0_1] : memref<1x4x256xf32, #tpu.memory_space<vmem>>, vector<1x4x256xf32>
    %1 = vector.shape_cast %0 : vector<1x4x256xf32> to vector<4x256xf32>
    %2 = arith.mulf %1, %1 : vector<4x256xf32>
    %cst = arith.constant dense<0.000000e+00> : vector<256xf32>
    %3 = vector.multi_reduction <add>, %2, %cst [0] : vector<4x256xf32> to vector<256xf32>
    %4 = vector.shape_cast %3 : vector<256xf32> to vector<1x256xf32>
    %5 = math.sqrt %4 : vector<1x256xf32>
    %cst_2 = arith.constant 1.000000e-10 : f32
    %6 = vector.broadcast %cst_2 : f32 to vector<1x256xf32>
    %7 = arith.addf %5, %6 : vector<1x256xf32>
    %cst_3 = arith.constant 1.000000e+00 : f32
    %8 = vector.broadcast %cst_3 : f32 to vector<1x256xf32>
    %9 = arith.divf %8, %7 : vector<1x256xf32>
    %c0_4 = arith.constant 0 : index
    %c0_5 = arith.constant 0 : index
    %10 = vector.load %arg3[%c0_4, %c0_5] : memref<4x1xf32, #tpu.memory_space<vmem>>, vector<4x1xf32>
    %c0_6 = arith.constant 0 : index
    %c0_7 = arith.constant 0 : index
    %c0_8 = arith.constant 0 : index
    %11 = vector.load %arg2[%c0_6, %c0_7, %c0_8] : memref<1x4x256xf32, #tpu.memory_space<vmem>>, vector<1x4x256xf32>
    %12 = vector.shape_cast %11 : vector<1x4x256xf32> to vector<4x256xf32>
    %13 = vector.broadcast %10 : vector<4x1xf32> to vector<4x256xf32>
    %14 = arith.mulf %13, %12 : vector<4x256xf32>
    %15 = vector.broadcast %9 : vector<1x256xf32> to vector<4x256xf32>
    %16 = arith.mulf %14, %15 : vector<4x256xf32>
    %c0_9 = arith.constant 0 : index
    %c0_10 = arith.constant 0 : index
    %c0_11 = arith.constant 0 : index
    %17 = vector.load %arg4[%c0_9, %c0_10, %c0_11] : memref<1x4x256xf32, #tpu.memory_space<vmem>>, vector<1x4x256xf32>
    %18 = vector.shape_cast %17 : vector<1x4x256xf32> to vector<4x256xf32>
    %19 = vector.shape_cast %16 : vector<4x256xf32> to vector<1x4x256xf32>
    tpu.vector_store %arg4[%c0_9, %c0_10, %c0_11], %19 {strides = array<i32>} : memref<1x4x256xf32, #tpu.memory_space<vmem>>, vector<1x4x256xf32>,
    return
  }
  func.func @transform_0(%arg0: i32, %arg1: i32) -> (i32, i32, i32) {
    %c0_i32 = arith.constant 0 : i32
    %c0_i32_0 = arith.constant 0 : i32
    return %arg0, %c0_i32, %arg1 : i32, i32, i32
  }
  func.func @transform_1(%arg0: i32, %arg1: i32) -> (i32, i32) {
    %c0_i32 = arith.constant 0 : i32
    %c0_i32_0 = arith.constant 0 : i32
    %c0_i32_1 = arith.constant 0 : i32
    return %c0_i32, %c0_i32_0 : i32, i32
  }
  func.func @transform_2(%arg0: i32, %arg1: i32) -> (i32, i32, i32) {
    %c0_i32 = arith.constant 0 : i32
    %c0_i32_0 = arith.constant 0 : i32
    return %arg0, %c0_i32, %arg1 : i32, i32, i32
  }
}

</mosaic_0001>

<bundles_post_ra>
// kernel: tpu_custom_call.1
= control target key start
LH: loop header
LB: loop body
LE: loop exit
PB: predicated region body
PF: predicated region fallthrough
CT: control target
= control target key end

     0   :  { %7 = vsyncpa [#allocation3], 0  ;;  %s740_s0 = inlined_call_operand.hbm [shape: f32[2,4,256], index: 0, kind: input, shape index: {}]   ;;  %s741_s1 = inlined_call_operand.vmem [shape: f32[4,1], index: 1, kind: input, shape index: {}]   ;;  %s742_s2 = inlined_call_operand.hbm [shape: f32[2,4,256], index: 2, kind: output, shape index: {}]  }
   0x1   :  { %9 = vsyncpa [#allocation3 + $0x1], 0 }
   0x2   :  { %10 = vsyncpa [#allocation4], 0 }
   0x3   :  { %12 = vsyncpa [#allocation4 + $0x1], 0  ;;  %s561_s9 = smov 0   ;;  %s563_s10 = smov 0  }
   0x4   :  { %s565_s11 = smov 0   ;;  %s567_s12 = smov 0  }
   0x5   :  { %s569_s13 = smov 0   ;;  %s571_s14 = smov 0  }
   0x6 LB: > { %s339_s15 = sadd.s32 4294967295, %s541_s14   ;;  %s340_s16 = sadd.s32 4294967294, %s541_s14   ;;  %s541_s14 = sphi %s571_s14, %s18_s14   ;;  %s537_s13 = sphi %s569_s13, %s758_s13   ;;  %s533_s12 = sphi %s567_s12, %s757_s12   ;;  %s529_s11 = sphi %s565_s11, %s756_s11   ;;  %s525_s10 = sphi %s563_s10, %s755_s10   ;;  %s521_s9 = sphi %s561_s9, %s754_s9  }
   0x7   : > { %s30_s17 = sadd.s32 1, %s537_s13  ;;  %s39_s18 = sadd.s32 1, %s529_s11 }
   0x8   : > { %p32_p0 = scmp.ge.s32.totalorder %s30_s17, 2  ;;  %p46_p1 = scmp.ne.s32.totalorder %s529_s11, %s525_s10 }
   0x9   : > { %p47_p2 = scmp.eq.s32.totalorder %s541_s14, 0  ;;  %p52_p3 = scmp.ne.s32.totalorder %s525_s10, %s521_s9 }
   0xa   : > { %s760_s17 = smov (%p32_p0, %s30_s17), 0  ;;  %p53_p5 = scmp.eq.s32.totalorder %s339_s15, 0 }
   0xb   : > { %p602_p4 = por %p47_p2, %p46_p1  ;;  %s34_s20 = ssub.s32 %s537_s13, %s760_s17 }
   0xc   : > { %p99_p6 = scmp.eq.s32.totalorder %s339_s15, 1  ;;  %p37_p7 = scmp.eq.s32.totalorder %s34_s20, 0 }
   0xd   : > { %p608_p8 = por %p53_p5, %p52_p3  ;;  %p105_p10 = scmp.eq.s32.totalorder %s340_s16, 1 }
   0xe   : > { %p612_p9 = por %p99_p6, %p46_p1  ;;  %p368_p13 = scmp.lt.s32.totalorder %s541_s14, 2 }
   0xf   : > { %s617_s23 = scalar_select %p37_p7, %s529_s11, %s39_s18  }
  0x10   : > { %s746_s22 = scalar_select %p612_p9, 1, 0 }
  0x11   : > { %p619_p11 = por %p105_p10, %p52_p3  ;;  %s128_s25 = sand.u32 1, %s529_s11  }
  0x12   : > { %s343_s26 = sshll.u32 %s128_s25, 3  ;;  %s354_s27 = sshll.u32 %s537_s13, 7 }
  0x13   : > { %s747_s24 = scalar_select %p619_p11, 1, 0 }
  0x14   : > { %s630_s30 = scalar_lea.hbm %s740_s0, %s354_s27  ;;  %s132_s3 = scalar_lea.vmem [#allocation2], %s343_s26 }
  0x15   : > { %s142_s4 = sshll.u32 %s132_s3, 4  ;;  %p636_p0 = pnand %p368_p13, %p602_p4  ;;  %s632_s4 = int_to_ptr.vmem [resolvable:$true] %s142_s4 }
  0x16   : > { %s129_s6 = scalar_lea.sflag [#allocation3], %s128_s25  ;;  %s429_s7 = scalar_lea.hbm %s630_s30, 128 }
  0x17   : > { %p430_p3 = scmp.ne.s32.totalorder %s630_s30, %s429_s7  ;;  %p431_p5 = pneg %p636_p0 }
  0x18   : > { %s434_s16 = scalar_lea.hbm %s740_s0, 256  ;;  %p435_p4 = scmp.lt.u32.totalorder %s630_s30, %s740_s0 }
  0x19   : > { %p432_p6 = pnand %p431_p5, %p430_p3  ;;  %p436_p10 = scmp.lt.u32.totalorder %s434_s16, %s429_s7 }
  0x1a   : > { %p438_p12 = scmp.lt.u32.totalorder %s429_s7, %s630_s30 }
  0x1b   : > { %p433_p7 = pneg %p432_p6  ;;  %p437_p13 = por %p436_p10, %p435_p4 }
  0x1d   : > { %p439_p1 = por %p438_p12, %p437_p13 }
  0x1f   : > { %p440_p2 = pnand %p439_p1, %p433_p7 }
  0x21   : > { %443 = shalt.err (!%p440_p2)
}
  0x22   : > { %s444_s20 = scalar_lea.vmem %s632_s4, 128  ;;  %s543_s25 = smov [#allocation2]  }
  0x23   : > { %p445_p3 = scmp.ne.s32.totalorder %s632_s4, %s444_s20  ;;  %s449_s26 = sshll.u32 %s543_s25, 4  ;;  %s450_s26 = int_to_ptr.vmem [resolvable:$false] %s449_s26 }
  0x24   : > { %s451_s27 = scalar_lea.vmem %s450_s26, 256  ;;  %p452_p9 = scmp.lt.s32.totalorder %s632_s4, %s450_s26 }
  0x25   : > { %p447_p6 = pnand %p445_p3, %p431_p5  ;;  %p453_p4 = scmp.lt.s32.totalorder %s451_s27, %s444_s20 }
  0x27   : > { %p448_p11 = pneg %p447_p6  ;;  %p454_p10 = por %p453_p4, %p452_p9 }
  0x29   : > { %p455_p12 = pnand %p454_p10, %p448_p11 }
  0x2b   : > { %458 = shalt.err (!%p455_p12)
}
  0x2c   : > { %363 = dma.hbm_to_vmem [thread:$0]  (!%p636_p0), %s630_s30, 128, %s632_s4, %s129_s6  }
  0x2d   : > { %p749_p1 = scmp.lt.s32.totalorder %s541_s14, 3  ;;  %p750_p2 = scmp.ge.s32.totalorder %s541_s14, 1 }
  0x2f   : > { %p148_p5 = pnand %p750_p2, %p749_p1 }
  0x30   : > { %s672_s28 = sand.u32 (!%p148_p5), 1, %s525_s10  }
  0x31   : > { %151 = sbr.rel (%p148_p5) target bundleno = 207 (0xcf), region = 28  ;;  %s347_s29 = sshll.u32 (!%p148_p5), %s672_s28, 3 }
  0x32   : > { %s154_s3 = scalar_lea.sflag (!%p148_p5), [#allocation3], %s672_s28  ;;  %s157_s5 = scalar_lea.vmem (!%p148_p5), [#allocation2], %s347_s29 }
  0x38   : > { %512 = dma.done.wait (%p608_p8), %s154_s3, 128  }
  0x39   : > { %514 = vsyncadd (%p608_p8), %s154_s3, 4294967168  ;;  %v544_v0 = vmov 0   ;;  %v220_v1 = vld [vmem:[%s741_s1] sm:$0xf]  ;;  %vm185_vm0 = vcmask 1043456   ;;  %s355_s21 = sshll.u32 %s533_s12, 7 }
  0x3a   : > { %419 = vset.pattern.permute.xlu0 %v544_v0  ;;  %v180_v2 = vld [vmem:[%s157_s5] sm:$0xff]  ;;  %s177_s6 = scalar_lea.vmem [#allocation5], %s347_s29  ;;  %s691_s16 = scalar_lea.hbm %s742_s2, %s355_s21 }
  0x3b   : > { %223 = vperm.xlu0 %419, %v220_v1   ;;  %v181_v3 = vmul.f32 %v180_v2, %v180_v2  ;;  %v227_v31 = vcombine.high %v180_v2, %v180_v2  ;;  %s255_s7 = sshll.u32 %s177_s6, 4  ;;  %s239_s18 = scalar_lea.sflag [#allocation4], %s672_s28  ;;  %s693_s7 = int_to_ptr.vmem [resolvable:$true] %s255_s7 }
  0x3c   : > { %s459_s19 = scalar_lea.vmem %s693_s7, 128  ;;  %p751_p9 = scmp.ne.s32.totalorder %s746_s22, 0 }
  0x3d   : > { %v183_v4 = vcombine.high %v181_v3, %v181_v3  ;;  %v186_v5 = vsel %vm185_vm0, %v181_v3, 0.0  ;;  %p460_p8 = scmp.ne.s32.totalorder %s693_s7, %s459_s19  ;;  %s545_s12 = smov [#allocation5]  }
  0x3e   : > { %v187_v7 = vrot.slane %v186_v5, 4  ;;  %s463_s20 = sshll.u32 %s545_s12, 4  ;;  %s464_s20 = int_to_ptr.vmem [resolvable:$false] %s463_s20 }
  0x3f   : > { %v193_v6 = vsel %vm185_vm0, %v183_v4, 0.0  ;;  %p461_p11 = pnand %p460_p8, %p751_p9  ;;  %s465_s25 = scalar_lea.vmem %s464_s20, 256 }
  0x40   : > { %v194_v8 = vrot.slane %v193_v6, 4  ;;  %v188_v9 = vadd.f32 %v187_v7, %v186_v5  ;;  %p466_p7 = scmp.lt.s32.totalorder %s693_s7, %s464_s20  ;;  %p467_p13 = scmp.lt.s32.totalorder %s465_s25, %s459_s19 }
  0x41   : > { %p462_p0 = pneg %p461_p11 }
  0x42   : > { %v195_v10 = vadd.f32 %v194_v8, %v193_v6  ;;  %v189_v11 = vrot.slane %v188_v9, 2  ;;  %p468_p3 = por %p467_p13, %p466_p7 }
  0x44   : > { %v196_v12 = vrot.slane %v195_v10, 2  ;;  %v190_v13 = vadd.f32 %v189_v11, %v188_v9  ;;  %p469_p6 = pnand %p468_p3, %p462_p0 }
  0x46   : > { %v197_v14 = vadd.f32 %v196_v12, %v195_v10  ;;  %v191_v15 = vrot.slane %v190_v13, 1 }
  0x48   : > { %v198_v16 = vrot.slane %v197_v14, 1  ;;  %v192_v17 = vadd.f32 %v191_v15, %v190_v13 }
  0x4a   : > { %v199_v18 = vadd.f32 %v198_v16, %v197_v14  ;;  %421 = vrsqrt.f32 %v192_v17  ;;  %vm202_vm1 = vcmp.eq.f32.partialorder %v192_v17, inf  ;;  %v205_v23 = vand.u32 2147483648, %v192_v17 }
  0x4b   : > { %vm204_vm3 = vcmp.eq.f32.partialorder %v192_v17, 0.0 }
  0x4c   : > { %423 = vrsqrt.f32 %v199_v18  ;;  %vm209_vm2 = vcmp.eq.f32.partialorder %v199_v18, inf  ;;  %v212_v25 = vand.u32 2147483648, %v199_v18  ;;  %vm211_vm4 = vcmp.eq.f32.partialorder %v199_v18, 0.0 }
  0x54   : > { %v422_v19 = vpop.eup %421 }
  0x55   : > { %v201_v21 = vmul.f32 %v422_v19, %v192_v17 }
  0x56   : > { %v424_v20 = vpop.eup %423 }
  0x57   : > { %v208_v22 = vmul.f32 %v424_v20, %v199_v18  ;;  %v203_v24 = vsel %vm202_vm1, %v192_v17, %v201_v21 }
  0x58   : > { %v206_v27 = vsel %vm204_vm3, %v205_v23, %v203_v24 }
  0x59   : > { %v210_v26 = vsel %vm209_vm2, %v199_v18, %v208_v22  ;;  %v214_v29 = vadd.f32 1e-10, %v206_v27 }
  0x5a   : > { %v213_v28 = vsel %vm211_vm4, %v212_v25, %v210_v26 }
  0x5b   : > { %v215_v30 = vadd.f32 1e-10, %v213_v28  ;;  %425 = vrcp.f32 %v214_v29 }
  0x5d   : > { %427 = vrcp.f32 %v215_v30 }
  0x65   : > { %v426_v32 = vpop.eup %425 }
  0x67   : > { %v428_v33 = vpop.eup %427 }
  0xba   : > { %v224_v34 = vpop.permute.xlu0 %223 }
  0xbb   : > { %v229_v35 = vmul.f32 %v224_v34, %v180_v2  ;;  %v230_v36 = vmul.f32 %v227_v31, %v224_v34 }
  0xbd   : > { %v231_v37 = vmul.f32 %v426_v32, %v229_v35  ;;  %v232_v38 = vmul.f32 %v428_v33, %v230_v36 }
  0xbf   : > { %v235_v39 = vcombine.low %v231_v37, %v232_v38 }
  0xc1   : > { %237 = vst [vmem:[%s177_s6] sm:$0xff] %v235_v39 }
  0xc2   : > { %472 = shalt.err (!%p469_p6)
}
  0xc3   : > { %s473_s26 = scalar_lea.hbm %s691_s16, 128  ;;  %s477_s29 = scalar_lea.hbm %s742_s2, 256 }
  0xc4   : > { %p474_p4 = scmp.ne.s32.totalorder %s691_s16, %s473_s26  ;;  %p478_p1 = scmp.lt.u32.totalorder %s691_s16, %s742_s2 }
  0xc5   : > { %p479_p2 = scmp.lt.u32.totalorder %s477_s29, %s473_s26  ;;  %p481_p8 = scmp.lt.u32.totalorder %s473_s26, %s691_s16 }
  0xc6   : > { %p475_p10 = pnand %p474_p4, %p751_p9 }
  0xc7   : > { %p480_p5 = por %p479_p2, %p478_p1 }
  0xc8   : > { %p476_p12 = pneg %p475_p10 }
  0xc9   : > { %p482_p11 = por %p481_p8, %p480_p5 }
  0xcb   : > { %p483_p0 = pnand %p482_p11, %p476_p12 }
  0xcd   : > { %486 = shalt.err (!%p483_p0)
}
  0xce   : > { %358 = dma.vmem_to_hbm [thread:$0]  (%p751_p9), %s693_s7, 128, %s691_s16, %s239_s18  }
  0xcf PF: > { %s267_s30 = sand.u32 1, %s521_s9   ;;  %p752_p7 = scmp.ne.s32.totalorder %s747_s24, 0 }
  0xd0   : > { %p753_p13 = scmp.ge.s32.totalorder %s541_s14, 2  ;;  %s268_s4 = scalar_lea.sflag [#allocation4], %s267_s30 }
  0xd2   : > { %p365_p3 = pnand %p753_p13, %p752_p7 }
  0xd4   : > { %516 = dma.done.wait (!%p365_p3), %s268_s4, 128  }
  0xd5   : > { %518 = vsyncadd (!%p365_p3), %s268_s4, 4294967168  ;;  %s18_s14 = sadd.s32 1, %s541_s14   ;;  %s754_s9 = smov %s525_s10 }
  0xd6   : > { %p15_p6 = scmp.ge.s32.totalorder %s18_s14, 4   ;;  %s755_s10 = smov %s529_s11 }
  0xd7   : > { %s756_s11 = smov %s617_s23  ;;  %s757_s12 = smov %s537_s13 }
  0xd8   : > { %s758_s13 = smov %s760_s17  ;;  %17 = sbr.rel (!%p15_p6) target bundleno = 6 (0x6), region = 73 }
  0xdf   :  { %273 = vsyncpa [#allocation3], 1 }
  0xe0   :  { %275 = vsyncpa [#allocation3 + $0x1], 1 }
  0xe1   :  { %276 = vsyncpa [#allocation4], 1 }
  0xe2   :  { %278 = vsyncpa [#allocation4 + $0x1], 1 }

</bundles_post_ra>
